<compile_context>
chip_gen: v5e
topology: v5e:2x2
jax: 0.10.0
libtpu: 0.0.40
codegen_flags: <defaults>
</compile_context>

<pallas_src>
import functools
import math

import jax
import jax.numpy as jnp
from jax.experimental import pallas as pl
from jax.experimental.pallas import tpu as pltpu


# ----------------------------------------------------------------------------
# Generation-aware VMEM budget.
# ----------------------------------------------------------------------------
@functools.lru_cache(maxsize=1)
def _vmem_limit_bytes():
    """~3/4 of physical VMEM, capped at 96 MiB (v7x -> ~48 MiB, v5e/v6e -> 96)."""
    try:
        cap = pltpu.get_tpu_info().vmem_capacity_bytes
    except Exception:
        cap = 64 * 1024 * 1024  # conservative fallback (v7x-sized)
    return int(min(cap * 3 // 4, 96 * 1024 * 1024))


def _head_group_width(embed_dim, head_dim):
    """Width (in lanes) of a 128-lane-aligned head group."""
    if embed_dim <= 128:
        return embed_dim
    group = (head_dim * 128) // math.gcd(head_dim, 128)  # lcm(head_dim, 128)
    if group <= embed_dim and embed_dim % group == 0:
        return group
    return embed_dim  # fallback: all heads in one group


# ----------------------------------------------------------------------------
# Kernel 1: fused Q/K/V projection.
#   q = x @ (Wq*scale) + bq*scale ; k = x @ Wk + bk ; v = x @ Wv + bv
# Tiled over M (rows of the flattened (B*T, E) activation) and N (= E); the
# x tile is read once per M tile and reused for all three dots, weight tiles
# stream through VMEM (double-buffered at (E, tn) granularity).
# ----------------------------------------------------------------------------
def qkv_kernel(x_ref, wq_ref, wk_ref, wv_ref, bq_ref, bk_ref, bv_ref,
               q_ref, k_ref, v_ref):
    x = x_ref[...]
    q_ref[...] = (jnp.dot(x, wq_ref[...], preferred_element_type=jnp.float32)
                  + bq_ref[...]).astype(q_ref.dtype)
    k_ref[...] = (jnp.dot(x, wk_ref[...], preferred_element_type=jnp.float32)
                  + bk_ref[...]).astype(k_ref.dtype)
    v_ref[...] = (jnp.dot(x, wv_ref[...], preferred_element_type=jnp.float32)
                  + bv_ref[...]).astype(v_ref.dtype)


def qkv_projection(x2d, wq, wk, wv, bq, bk, bv, *, tm=512, tn=512,
                   out_dtype=None):
    """x2d: (M, E); w*: (E, E); b*: (1, E) -> 3 x (M, E)."""
    M, K = x2d.shape
    N = wq.shape[1]
    out_dtype = out_dtype or x2d.dtype
    tm = min(tm, M)
    tn = min(tn, N)
    grid = (pl.cdiv(M, tm), pl.cdiv(N, tn))
    out_sdt = jax.ShapeDtypeStruct((M, N), out_dtype)
    w_spec = pl.BlockSpec((K, tn), lambda i, j: (0, j))
    b_spec = pl.BlockSpec((1, tn), lambda i, j: (0, j))
    o_spec = pl.BlockSpec((tm, tn), lambda i, j: (i, j))
    return pl.pallas_call(
        qkv_kernel,
        out_shape=(out_sdt, out_sdt, out_sdt),
        grid=grid,
        in_specs=[
            pl.BlockSpec((tm, K), lambda i, j: (i, 0)),
            w_spec, w_spec, w_spec,
            b_spec, b_spec, b_spec,
        ],
        out_specs=(o_spec, o_spec, o_spec),
        compiler_params=pltpu.CompilerParams(
            dimension_semantics=("parallel", "parallel"),
            vmem_limit_bytes=_vmem_limit_bytes(),
        ),
    )(x2d, wq, wk, wv, bq, bk, bv)


# ----------------------------------------------------------------------------
# Kernel 2: generic tiled linear  y = x @ W + b  (used for out_proj).
# Tiled over M and N, both axes "parallel", full K per step.
# ----------------------------------------------------------------------------
def linear_kernel(x_ref, w_ref, b_ref, o_ref):
    o_ref[...] = (
        jnp.dot(x_ref[...], w_ref[...], preferred_element_type=jnp.float32)
        + b_ref[...]
    ).astype(o_ref.dtype)


def linear(x2d, w, b, *, tm=512, tn=512, out_dtype=None):
    """x2d: (M, K), w: (K, N), b: (1, N) -> (M, N)."""
    M, K = x2d.shape
    N = w.shape[1]
    out_dtype = out_dtype or x2d.dtype
    tm = min(tm, M)
    tn = min(tn, N)
    grid = (pl.cdiv(M, tm), pl.cdiv(N, tn))
    return pl.pallas_call(
        linear_kernel,
        out_shape=jax.ShapeDtypeStruct((M, N), out_dtype),
        grid=grid,
        in_specs=[
            pl.BlockSpec((tm, K), lambda i, j: (i, 0)),
            pl.BlockSpec((K, tn), lambda i, j: (0, j)),
            pl.BlockSpec((1, tn), lambda i, j: (0, j)),
        ],
        out_specs=pl.BlockSpec((tm, tn), lambda i, j: (i, j)),
        compiler_params=pltpu.CompilerParams(
            dimension_semantics=("parallel", "parallel"),
            vmem_limit_bytes=_vmem_limit_bytes(),
        ),
    )(x2d, w, b)


# ----------------------------------------------------------------------------
# Kernel 3: multi-head attention, flash-style online softmax.
# Grid = (B, head_group, q_tile, kv_tile).  Each step sees a (tq, GW) query
# tile and a (tS, GW) K/V tile of ONE 128-lane-aligned head group; only a
# tiny static loop over the (1-2) heads inside the group remains.  Running
# max / denom (lane-padded) and the (tq, GW) accumulator live in f32 VMEM
# scratch and persist across the kv axis; the output is written once,
# lane-dense, at the last kv step.
# ----------------------------------------------------------------------------
def attn_kernel(q_ref, k_ref, v_ref, o_ref, m_sc, l_sc, acc_sc, *,
                heads_per_group, head_dim, kv_len, ragged_kv):
    kv = pl.program_id(3)

    @pl.when(kv == 0)
    def _init():
        m_sc[...] = jnp.full_like(m_sc, -jnp.inf)
        l_sc[...] = jnp.zeros_like(l_sc)
        acc_sc[...] = jnp.zeros_like(acc_sc)

    q_g = q_ref[0]  # (tq, GW)   - q already scaled via folded weights
    k_g = k_ref[0]  # (tS, GW)
    v_g = v_ref[0]  # (tS, GW)
    tS = k_g.shape[0]

    if ragged_kv:
        base = kv * tS
        col_ids = jax.lax.broadcasted_iota(jnp.int32, (1, tS), 1) + base
        col_valid = col_ids < kv_len                       # (1, tS)
        row_ids = jax.lax.broadcasted_iota(jnp.int32, (tS, 1), 0) + base
        # Zero padded V rows so p@v cannot pick up garbage from the OOB tile.
        v_g = jnp.where(row_ids < kv_len, v_g, jnp.zeros_like(v_g))

    for h in range(heads_per_group):   # tiny static loop (1-2 heads typical)
        lo = h * head_dim
        hi = lo + head_dim
        q_h = q_g[:, lo:hi]            # (tq, Dh)
        k_h = k_g[:, lo:hi]            # (tS, Dh)
        v_h = v_g[:, lo:hi]            # (tS, Dh)

        # q @ k^T without materializing a transpose: contract the Dh axes.
        s = jax.lax.dot_general(
            q_h, k_h, (((1,), (1,)), ((), ())),
            preferred_element_type=jnp.float32,
        )  # (tq, tS), f32
        if ragged_kv:
            s = jnp.where(col_valid, s, -jnp.inf)

        m_prev = m_sc[:, h:h + 1]                                   # (tq, 1)
        m_new = jnp.maximum(m_prev, jnp.max(s, axis=-1, keepdims=True))
        alpha = jnp.exp(m_prev - m_new)                             # (tq, 1)
        p = jnp.exp(s - m_new)                                      # (tq, tS)

        l_sc[:, h:h + 1] = alpha * l_sc[:, h:h + 1] + jnp.sum(
            p, axis=-1, keepdims=True)
        pv = jax.lax.dot_general(
            p.astype(v_h.dtype), v_h, (((1,), (0,)), ((), ())),
            preferred_element_type=jnp.float32,
        )  # (tq, Dh)
        acc_sc[:, lo:hi] = alpha * acc_sc[:, lo:hi] + pv
        m_sc[:, h:h + 1] = m_new

    @pl.when(kv == pl.num_programs(3) - 1)
    def _finalize():
        # Scale the accumulator per head IN PLACE, then a single lane-dense
        # (tq, GW) store (no concatenate / extra VMEM temporary).
        for h in range(heads_per_group):
            lo = h * head_dim
            hi = lo + head_dim
            inv = pl.reciprocal(l_sc[:, h:h + 1], approx=True)
            acc_sc[:, lo:hi] = acc_sc[:, lo:hi] * inv
        o_ref[0] = acc_sc[...].astype(o_ref.dtype)


def attention(q, k, v, num_heads, *, q_tile=512, kv_tile=1024):
    """q: (B, T, E); k, v: (B, S, E) -> (B, T, E) context (heads merged)."""
    B, T, E = q.shape
    S = k.shape[1]
    assert E % num_heads == 0
    Dh = E // num_heads
    GW = _head_group_width(E, Dh)       # 128-lane-aligned head-group width
    G = GW // Dh                        # heads per group
    n_groups = E // GW
    tq = min(q_tile, T)
    tS = min(kv_tile, S)
    ragged_kv = (S % tS) != 0
    n_q = pl.cdiv(T, tq)
    n_kv = pl.cdiv(S, tS)
    ml_cols = ((G + 127) // 128) * 128  # lane-padded softmax-stat scratch

    kernel = functools.partial(
        attn_kernel, heads_per_group=G, head_dim=Dh, kv_len=S,
        ragged_kv=ragged_kv)

    return pl.pallas_call(
        kernel,
        out_shape=jax.ShapeDtypeStruct((B, T, E), q.dtype),
        grid=(B, n_groups, n_q, n_kv),
        in_specs=[
            pl.BlockSpec((1, tq, GW), lambda b, g, qi, kv: (b, qi, g)),
            pl.BlockSpec((1, tS, GW), lambda b, g, qi, kv: (b, kv, g)),
            pl.BlockSpec((1, tS, GW), lambda b, g, qi, kv: (b, kv, g)),
        ],
        out_specs=pl.BlockSpec((1, tq, GW), lambda b, g, qi, kv: (b, qi, g)),
        scratch_shapes=[
            pltpu.VMEM((tq, ml_cols), jnp.float32),  # running max per head
            pltpu.VMEM((tq, ml_cols), jnp.float32),  # running denom per head
            pltpu.VMEM((tq, GW), jnp.float32),       # output accumulator
        ],
        compiler_params=pltpu.CompilerParams(
            dimension_semantics=("parallel", "parallel", "parallel",
                                 "arbitrary"),
            vmem_limit_bytes=_vmem_limit_bytes(),
        ),
    )(q, k, v)


# ----------------------------------------------------------------------------
# Parameter preparation (done ONCE, outside the forward):
#   * fold head_dim**-0.5 scaling into q weights/bias,
#   * optionally cast matmul weights to a reduced compute dtype (bf16);
#     biases stay f32 (added to the f32 accumulator).
# ----------------------------------------------------------------------------
def prepare_params(raw, num_heads, compute_dtype=jnp.float32):
    E = raw["q_w"].shape[0]
    assert E % num_heads == 0, "embed_dim must be divisible by num_heads"
    scaling = (E // num_heads) ** (-0.5)
    return {
        "q_w": (raw["q_w"] * scaling).astype(compute_dtype),
        "q_b": (raw["q_b"] * scaling).astype(jnp.float32),
        "k_w": raw["k_w"].astype(compute_dtype),
        "k_b": raw["k_b"].astype(jnp.float32),
        "v_w": raw["v_w"].astype(compute_dtype),
        "v_b": raw["v_b"].astype(jnp.float32),
        "o_w": raw["o_w"].astype(compute_dtype),
        "o_b": raw["o_b"].astype(jnp.float32),
    }


# ----------------------------------------------------------------------------
# Full forward pass mirroring M2M100Attention.forward (self-attention path).
# Returns (attn_output, attn_weights_reshaped=None, past_key_value=None).
# TODO(synk): cross-attention / past_key_value cache-concat branches,
# attention_mask, layer_head_mask, output_attentions and dropout (training
# mode) are not exercised in this self-attention eval-mode kernel.
# TODO(synk): fusing the K/V projection into the attention kernel (projecting
# the current kv tile from x directly) would remove the q/k/v HBM round-trip.
# ----------------------------------------------------------------------------
def m2m100_attention_forward(hidden_states, prepared, num_heads):
    B, T, E = hidden_states.shape
    compute_dtype = prepared["q_w"].dtype

    x2d = hidden_states.reshape(B * T, E).astype(compute_dtype)

    q2d, k2d, v2d = qkv_projection(
        x2d,
        prepared["q_w"], prepared["k_w"], prepared["v_w"],
        prepared["q_b"], prepared["k_b"], prepared["v_b"],
        out_dtype=compute_dtype)

    # Free reshapes only -- no head transposes anywhere in the forward.
    q = q2d.reshape(B, T, E)
    k = k2d.reshape(B, T, E)
    v = v2d.reshape(B, T, E)

    ctx = attention(q, k, v, num_heads)  # (B, T, E), heads already merged

    out2d = linear(ctx.reshape(B * T, E), prepared["o_w"], prepared["o_b"],
                   out_dtype=hidden_states.dtype)
    out = out2d.reshape(B, T, E)
    return out, None, None


# ----------------------------------------------------------------------------
# Pure-JAX reference (uses the RAW params + explicit scaling, so it also
# verifies the scaling fold and the fused projection).
# ----------------------------------------------------------------------------
def reference_forward(hidden_states, params, num_heads):
    B, T, E = hidden_states.shape
    Dh = E // num_heads
    scaling = Dh ** (-0.5)
    x = hidden_states.reshape(B * T, E)
    q = (x @ params["q_w"] + params["q_b"]) * scaling
    k = x @ params["k_w"] + params["k_b"]
    v = x @ params["v_w"] + params["v_b"]

    def sh(t):
        return (t.reshape(B, T, num_heads, Dh)
                 .transpose(0, 2, 1, 3)
                 .reshape(B * num_heads, T, Dh))

    q, k, v = sh(q), sh(k), sh(v)
    s = jnp.einsum("btd,bsd->bts", q, k)
    p = jax.nn.softmax(s, axis=-1)
    o = jnp.einsum("bts,bsd->btd", p, v)
    o = o.reshape(B, num_heads, T, Dh).transpose(0, 2, 1, 3).reshape(B * T, E)
    return (o @ params["o_w"] + params["o_b"]).reshape(B, T, E)


if __name__ == "__main__":
    # Small config consistent with the module (embed_dim divisible by heads).
    B, T, E, H = 2, 8, 32, 4

    key = jax.random.PRNGKey(0)
    keys = jax.random.split(key, 9)

    def init_w(k):
        return jax.random.normal(k, (E, E), dtype=jnp.float32) * 0.05

    def init_b(k):
        return jax.random.normal(k, (1, E), dtype=jnp.float32) * 0.01

    raw_params = {
        "q_w": init_w(keys[0]), "q_b": init_b(keys[1]),
        "k_w": init_w(keys[2]), "k_b": init_b(keys[3]),
        "v_w": init_w(keys[4]), "v_b": init_b(keys[5]),
        "o_w": init_w(keys[6]), "o_b": init_b(keys[7]),
    }

    hidden_states = jax.random.normal(keys[8], (B, T, E), dtype=jnp.float32)
    ref = reference_forward(hidden_states, raw_params, H)

    fwd = jax.jit(m2m100_attention_forward, static_argnums=(2,))

    # --- f32 path: tight numerical check -----------------------------------
    prepared_f32 = prepare_params(raw_params, num_heads=H,
                                  compute_dtype=jnp.float32)
    out, attn_w, past_kv = fwd(hidden_states, prepared_f32, H)
    out = jax.block_until_ready(out)
    assert out.shape == (B, T, E)
    assert attn_w is None and past_kv is None
    # Slightly relaxed tolerance: softmax denominator uses the approximate
    # EUP reciprocal (pl.reciprocal(..., approx=True)).
    assert jnp.allclose(out, ref, atol=5e-3, rtol=5e-3), "f32 mismatch vs ref"

    # --- bf16 MXU-operand path (f32 accumulation / softmax): looser check ---
    prepared_bf16 = prepare_params(raw_params, num_heads=H,
                                   compute_dtype=jnp.bfloat16)
    out_bf16, _, _ = fwd(hidden_states, prepared_bf16, H)
    out_bf16 = jax.block_until_ready(out_bf16)
    assert out_bf16.shape == (B, T, E)
    assert jnp.allclose(out_bf16, ref, atol=5e-2, rtol=5e-2), \
        "bf16 mismatch vs ref"

    print("KERNEL_OK")
</pallas_src>

<mosaic_0001>
module attributes {stable_mosaic.version = 11 : i64} {
  func.func @qkv_kernel(%arg0: i32, %arg1: i32, %arg2: memref<16x32xf32, #tpu.memory_space<vmem>>, %arg3: memref<32x32xf32, #tpu.memory_space<vmem>>, %arg4: memref<32x32xf32, #tpu.memory_space<vmem>>, %arg5: memref<32x32xf32, #tpu.memory_space<vmem>>, %arg6: memref<1x32xf32, #tpu.memory_space<vmem>>, %arg7: memref<1x32xf32, #tpu.memory_space<vmem>>, %arg8: memref<1x32xf32, #tpu.memory_space<vmem>>, %arg9: memref<16x32xf32, #tpu.memory_space<vmem>>, %arg10: memref<16x32xf32, #tpu.memory_space<vmem>>, %arg11: memref<16x32xf32, #tpu.memory_space<vmem>>) attributes {dimension_semantics = [#tpu.dimension_semantics<parallel>, #tpu.dimension_semantics<parallel>], iteration_bounds = array<i64: 1, 1>, scalar_prefetch = 0 : i64, scratch_operands = 0 : i64, tpu.core_type = #tpu.core_type<tc>, window_params = [{transform_indices = @transform_0, window_bounds = array<i64: 16, 32>}, {transform_indices = @transform_1, window_bounds = array<i64: 32, 32>}, {transform_indices = @transform_2, window_bounds = array<i64: 32, 32>}, {transform_indices = @transform_3, window_bounds = array<i64: 32, 32>}, {transform_indices = @transform_4, window_bounds = array<i64: 1, 32>}, {transform_indices = @transform_5, window_bounds = array<i64: 1, 32>}, {transform_indices = @transform_6, window_bounds = array<i64: 1, 32>}, {transform_indices = @transform_7, window_bounds = array<i64: 16, 32>}, {transform_indices = @transform_8, window_bounds = array<i64: 16, 32>}, {transform_indices = @transform_9, window_bounds = array<i64: 16, 32>}]} {
    %c0 = arith.constant 0 : index
    %c0_0 = arith.constant 0 : index
    %0 = vector.load %arg2[%c0, %c0_0] : memref<16x32xf32, #tpu.memory_space<vmem>>, vector<16x32xf32>
    %c0_1 = arith.constant 0 : index
    %c0_2 = arith.constant 0 : index
    %1 = vector.load %arg3[%c0_1, %c0_2] : memref<32x32xf32, #tpu.memory_space<vmem>>, vector<32x32xf32>
    %cst = arith.constant dense<0.000000e+00> : vector<16x32xf32>
    %2 = tpu.matmul %0, %1, %cst {dimension_numbers = #tpu.dot_dimension_numbers<[1], [0], [0], [1], [0, 0, 1, 1], [], []>} : vector<16x32xf32>, vector<32x32xf32>, vector<16x32xf32> -> vector<16x32xf32>
    %c0_3 = arith.constant 0 : index
    %c0_4 = arith.constant 0 : index
    %3 = vector.load %arg6[%c0_3, %c0_4] : memref<1x32xf32, #tpu.memory_space<vmem>>, vector<1x32xf32>
    %4 = vector.broadcast %3 : vector<1x32xf32> to vector<16x32xf32>
    %5 = arith.addf %2, %4 : vector<16x32xf32>
    %c0_5 = arith.constant 0 : index
    %c0_6 = arith.constant 0 : index
    %6 = vector.load %arg9[%c0_5, %c0_6] : memref<16x32xf32, #tpu.memory_space<vmem>>, vector<16x32xf32>
    tpu.vector_store %arg9[%c0_5, %c0_6], %5 {strides = array<i32>} : memref<16x32xf32, #tpu.memory_space<vmem>>, vector<16x32xf32>,
    %c0_7 = arith.constant 0 : index
    %c0_8 = arith.constant 0 : index
    %7 = vector.load %arg4[%c0_7, %c0_8] : memref<32x32xf32, #tpu.memory_space<vmem>>, vector<32x32xf32>
    %cst_9 = arith.constant dense<0.000000e+00> : vector<16x32xf32>
    %8 = tpu.matmul %0, %7, %cst_9 {dimension_numbers = #tpu.dot_dimension_numbers<[1], [0], [0], [1], [0, 0, 1, 1], [], []>} : vector<16x32xf32>, vector<32x32xf32>, vector<16x32xf32> -> vector<16x32xf32>
    %c0_10 = arith.constant 0 : index
    %c0_11 = arith.constant 0 : index
    %9 = vector.load %arg7[%c0_10, %c0_11] : memref<1x32xf32, #tpu.memory_space<vmem>>, vector<1x32xf32>
    %10 = vector.broadcast %9 : vector<1x32xf32> to vector<16x32xf32>
    %11 = arith.addf %8, %10 : vector<16x32xf32>
    %c0_12 = arith.constant 0 : index
    %c0_13 = arith.constant 0 : index
    %12 = vector.load %arg10[%c0_12, %c0_13] : memref<16x32xf32, #tpu.memory_space<vmem>>, vector<16x32xf32>
    tpu.vector_store %arg10[%c0_12, %c0_13], %11 {strides = array<i32>} : memref<16x32xf32, #tpu.memory_space<vmem>>, vector<16x32xf32>,
    %c0_14 = arith.constant 0 : index
    %c0_15 = arith.constant 0 : index
    %13 = vector.load %arg5[%c0_14, %c0_15] : memref<32x32xf32, #tpu.memory_space<vmem>>, vector<32x32xf32>
    %cst_16 = arith.constant dense<0.000000e+00> : vector<16x32xf32>
    %14 = tpu.matmul %0, %13, %cst_16 {dimension_numbers = #tpu.dot_dimension_numbers<[1], [0], [0], [1], [0, 0, 1, 1], [], []>} : vector<16x32xf32>, vector<32x32xf32>, vector<16x32xf32> -> vector<16x32xf32>
    %c0_17 = arith.constant 0 : index
    %c0_18 = arith.constant 0 : index
    %15 = vector.load %arg8[%c0_17, %c0_18] : memref<1x32xf32, #tpu.memory_space<vmem>>, vector<1x32xf32>
    %16 = vector.broadcast %15 : vector<1x32xf32> to vector<16x32xf32>
    %17 = arith.addf %14, %16 : vector<16x32xf32>
    %c0_19 = arith.constant 0 : index
    %c0_20 = arith.constant 0 : index
    %18 = vector.load %arg11[%c0_19, %c0_20] : memref<16x32xf32, #tpu.memory_space<vmem>>, vector<16x32xf32>
    tpu.vector_store %arg11[%c0_19, %c0_20], %17 {strides = array<i32>} : memref<16x32xf32, #tpu.memory_space<vmem>>, vector<16x32xf32>,
    return
  }
  func.func @transform_0(%arg0: i32, %arg1: i32) -> (i32, i32) {
    %c0_i32 = arith.constant 0 : i32
    %c0_i32_0 = arith.constant 0 : i32
    return %arg0, %c0_i32 : i32, i32
  }
  func.func @transform_1(%arg0: i32, %arg1: i32) -> (i32, i32) {
    %c0_i32 = arith.constant 0 : i32
    %c0_i32_0 = arith.constant 0 : i32
    return %c0_i32, %arg1 : i32, i32
  }
  func.func @transform_2(%arg0: i32, %arg1: i32) -> (i32, i32) {
    %c0_i32 = arith.constant 0 : i32
    %c0_i32_0 = arith.constant 0 : i32
    return %c0_i32, %arg1 : i32, i32
  }
  func.func @transform_3(%arg0: i32, %arg1: i32) -> (i32, i32) {
    %c0_i32 = arith.constant 0 : i32
    %c0_i32_0 = arith.constant 0 : i32
    return %c0_i32, %arg1 : i32, i32
  }
  func.func @transform_4(%arg0: i32, %arg1: i32) -> (i32, i32) {
    %c0_i32 = arith.constant 0 : i32
    %c0_i32_0 = arith.constant 0 : i32
    return %c0_i32, %arg1 : i32, i32
  }
  func.func @transform_5(%arg0: i32, %arg1: i32) -> (i32, i32) {
    %c0_i32 = arith.constant 0 : i32
    %c0_i32_0 = arith.constant 0 : i32
    return %c0_i32, %arg1 : i32, i32
  }
  func.func @transform_6(%arg0: i32, %arg1: i32) -> (i32, i32) {
    %c0_i32 = arith.constant 0 : i32
    %c0_i32_0 = arith.constant 0 : i32
    return %c0_i32, %arg1 : i32, i32
  }
  func.func @transform_7(%arg0: i32, %arg1: i32) -> (i32, i32) {
    %c0_i32 = arith.constant 0 : i32
    return %arg0, %arg1 : i32, i32
  }
  func.func @transform_8(%arg0: i32, %arg1: i32) -> (i32, i32) {
    %c0_i32 = arith.constant 0 : i32
    return %arg0, %arg1 : i32, i32
  }
  func.func @transform_9(%arg0: i32, %arg1: i32) -> (i32, i32) {
    %c0_i32 = arith.constant 0 : i32
    return %arg0, %arg1 : i32, i32
  }
}

module attributes {stable_mosaic.version = 11 : i64} {
  func.func @linear_kernel(%arg0: i32, %arg1: i32, %arg2: memref<16x32xf32, #tpu.memory_space<vmem>>, %arg3: memref<32x32xf32, #tpu.memory_space<vmem>>, %arg4: memref<1x32xf32, #tpu.memory_space<vmem>>, %arg5: memref<16x32xf32, #tpu.memory_space<vmem>>) attributes {dimension_semantics = [#tpu.dimension_semantics<parallel>, #tpu.dimension_semantics<parallel>], iteration_bounds = array<i64: 1, 1>, scalar_prefetch = 0 : i64, scratch_operands = 0 : i64, tpu.core_type = #tpu.core_type<tc>, window_params = [{transform_indices = @transform_0, window_bounds = array<i64: 16, 32>}, {transform_indices = @transform_1, window_bounds = array<i64: 32, 32>}, {transform_indices = @transform_2, window_bounds = array<i64: 1, 32>}, {transform_indices = @transform_3, window_bounds = array<i64: 16, 32>}]} {
    %c0 = arith.constant 0 : index
    %c0_0 = arith.constant 0 : index
    %0 = vector.load %arg2[%c0, %c0_0] : memref<16x32xf32, #tpu.memory_space<vmem>>, vector<16x32xf32>
    %c0_1 = arith.constant 0 : index
    %c0_2 = arith.constant 0 : index
    %1 = vector.load %arg3[%c0_1, %c0_2] : memref<32x32xf32, #tpu.memory_space<vmem>>, vector<32x32xf32>
    %cst = arith.constant dense<0.000000e+00> : vector<16x32xf32>
    %2 = tpu.matmul %0, %1, %cst {dimension_numbers = #tpu.dot_dimension_numbers<[1], [0], [0], [1], [0, 0, 1, 1], [], []>} : vector<16x32xf32>, vector<32x32xf32>, vector<16x32xf32> -> vector<16x32xf32>
    %c0_3 = arith.constant 0 : index
    %c0_4 = arith.constant 0 : index
    %3 = vector.load %arg4[%c0_3, %c0_4] : memref<1x32xf32, #tpu.memory_space<vmem>>, vector<1x32xf32>
    %4 = vector.broadcast %3 : vector<1x32xf32> to vector<16x32xf32>
    %5 = arith.addf %2, %4 : vector<16x32xf32>
    %c0_5 = arith.constant 0 : index
    %c0_6 = arith.constant 0 : index
    %6 = vector.load %arg5[%c0_5, %c0_6] : memref<16x32xf32, #tpu.memory_space<vmem>>, vector<16x32xf32>
    tpu.vector_store %arg5[%c0_5, %c0_6], %5 {strides = array<i32>} : memref<16x32xf32, #tpu.memory_space<vmem>>, vector<16x32xf32>,
    return
  }
  func.func @transform_0(%arg0: i32, %arg1: i32) -> (i32, i32) {
    %c0_i32 = arith.constant 0 : i32
    %c0_i32_0 = arith.constant 0 : i32
    return %arg0, %c0_i32 : i32, i32
  }
  func.func @transform_1(%arg0: i32, %arg1: i32) -> (i32, i32) {
    %c0_i32 = arith.constant 0 : i32
    %c0_i32_0 = arith.constant 0 : i32
    return %c0_i32, %arg1 : i32, i32
  }
  func.func @transform_2(%arg0: i32, %arg1: i32) -> (i32, i32) {
    %c0_i32 = arith.constant 0 : i32
    %c0_i32_0 = arith.constant 0 : i32
    return %c0_i32, %arg1 : i32, i32
  }
  func.func @transform_3(%arg0: i32, %arg1: i32) -> (i32, i32) {
    %c0_i32 = arith.constant 0 : i32
    return %arg0, %arg1 : i32, i32
  }
}

module attributes {stable_mosaic.version = 11 : i64} {
  func.func @attn_kernel(%arg0: i32, %arg1: i32, %arg2: i32, %arg3: i32, %arg4: memref<1x8x32xf32, #tpu.memory_space<vmem>>, %arg5: memref<1x8x32xf32, #tpu.memory_space<vmem>>, %arg6: memref<1x8x32xf32, #tpu.memory_space<vmem>>, %arg7: memref<1x8x32xf32, #tpu.memory_space<vmem>>, %arg8: memref<8x128xf32, #tpu.memory_space<vmem>>, %arg9: memref<8x128xf32, #tpu.memory_space<vmem>>, %arg10: memref<8x32xf32, #tpu.memory_space<vmem>>) attributes {dimension_semantics = [#tpu.dimension_semantics<parallel>, #tpu.dimension_semantics<parallel>, #tpu.dimension_semantics<parallel>, #tpu.dimension_semantics<arbitrary>], iteration_bounds = array<i64: 2, 1, 1, 1>, scalar_prefetch = 0 : i64, scratch_operands = 3 : i64, tpu.core_type = #tpu.core_type<tc>, window_params = [{transform_indices = @transform_0, window_bounds = array<i64: 1, 8, 32>}, {transform_indices = @transform_1, window_bounds = array<i64: 1, 8, 32>}, {transform_indices = @transform_2, window_bounds = array<i64: 1, 8, 32>}, {transform_indices = @transform_3, window_bounds = array<i64: 1, 8, 32>}]} {
    %c0_i32 = arith.constant 0 : i32
    %0 = arith.cmpi eq, %arg3, %c0_i32 : i32
    %1 = arith.extui %0 : i1 to i32
    %c0_i32_0 = arith.constant 0 : i32
    %2 = arith.cmpi ne, %1, %c0_i32_0 : i32
    scf.if %2 {
      %cst_68 = arith.constant 0xFF800000 : f32
      %116 = vector.broadcast %cst_68 : f32 to vector<8x128xf32>
      %c0_69 = arith.constant 0 : index
      %c0_70 = arith.constant 0 : index
      %117 = vector.load %arg8[%c0_69, %c0_70] : memref<8x128xf32, #tpu.memory_space<vmem>>, vector<8x128xf32>
      tpu.vector_store %arg8[%c0_69, %c0_70], %116 {strides = array<i32>} : memref<8x128xf32, #tpu.memory_space<vmem>>, vector<8x128xf32>,
      %cst_71 = arith.constant 0.000000e+00 : f32
      %118 = vector.broadcast %cst_71 : f32 to vector<8x128xf32>
      %c0_72 = arith.constant 0 : index
      %c0_73 = arith.constant 0 : index
      %119 = vector.load %arg9[%c0_72, %c0_73] : memref<8x128xf32, #tpu.memory_space<vmem>>, vector<8x128xf32>
      tpu.vector_store %arg9[%c0_72, %c0_73], %118 {strides = array<i32>} : memref<8x128xf32, #tpu.memory_space<vmem>>, vector<8x128xf32>,
      %cst_74 = arith.constant 0.000000e+00 : f32
      %120 = vector.broadcast %cst_74 : f32 to vector<8x32xf32>
      %c0_75 = arith.constant 0 : index
      %c0_76 = arith.constant 0 : index
      %121 = vector.load %arg10[%c0_75, %c0_76] : memref<8x32xf32, #tpu.memory_space<vmem>>, vector<8x32xf32>
      tpu.vector_store %arg10[%c0_75, %c0_76], %120 {strides = array<i32>} : memref<8x32xf32, #tpu.memory_space<vmem>>, vector<8x32xf32>,
    } else {
    }
    %c0 = arith.constant 0 : index
    %c0_1 = arith.constant 0 : index
    %c0_2 = arith.constant 0 : index
    %3 = vector.load %arg4[%c0, %c0_1, %c0_2] : memref<1x8x32xf32, #tpu.memory_space<vmem>>, vector<1x8x32xf32>
    %4 = vector.shape_cast %3 : vector<1x8x32xf32> to vector<8x32xf32>
    %c0_3 = arith.constant 0 : index
    %c0_4 = arith.constant 0 : index
    %c0_5 = arith.constant 0 : index
    %5 = vector.load %arg5[%c0_3, %c0_4, %c0_5] : memref<1x8x32xf32, #tpu.memory_space<vmem>>, vector<1x8x32xf32>
    %6 = vector.shape_cast %5 : vector<1x8x32xf32> to vector<8x32xf32>
    %c0_6 = arith.constant 0 : index
    %c0_7 = arith.constant 0 : index
    %c0_8 = arith.constant 0 : index
    %7 = vector.load %arg6[%c0_6, %c0_7, %c0_8] : memref<1x8x32xf32, #tpu.memory_space<vmem>>, vector<1x8x32xf32>
    %8 = vector.shape_cast %7 : vector<1x8x32xf32> to vector<8x32xf32>
    %9 = vector.extract_strided_slice %4 {offsets = [0, 0], sizes = [8, 8], strides = [1, 1]} : vector<8x32xf32> to vector<8x8xf32>
    %10 = vector.extract_strided_slice %6 {offsets = [0, 0], sizes = [8, 8], strides = [1, 1]} : vector<8x32xf32> to vector<8x8xf32>
    %11 = vector.extract_strided_slice %8 {offsets = [0, 0], sizes = [8, 8], strides = [1, 1]} : vector<8x32xf32> to vector<8x8xf32>
    %cst = arith.constant dense<0.000000e+00> : vector<8x8xf32>
    %12 = tpu.matmul %9, %10, %cst {dimension_numbers = #tpu.dot_dimension_numbers<[1], [1], [0], [0], [0, 0, 1, 0], [], []>} : vector<8x8xf32>, vector<8x8xf32>, vector<8x8xf32> -> vector<8x8xf32>
    %c0_9 = arith.constant 0 : index
    %c0_10 = arith.constant 0 : index
    %13 = vector.load %arg8[%c0_9, %c0_10] : memref<8x128xf32, #tpu.memory_space<vmem>>, vector<8x1xf32>
    %cst_11 = arith.constant dense<0xFF800000> : vector<8xf32>
    %14 = vector.multi_reduction <maximumf>, %12, %cst_11 [1] : vector<8x8xf32> to vector<8xf32>
    %15 = vector.shape_cast %14 : vector<8xf32> to vector<8x1xf32>
    %16 = arith.maximumf %13, %15 : vector<8x1xf32>
    %17 = arith.subf %13, %16 : vector<8x1xf32>
    %18 = math.exp %17 : vector<8x1xf32>
    %19 = vector.broadcast %16 : vector<8x1xf32> to vector<8x8xf32>
    %20 = arith.subf %12, %19 : vector<8x8xf32>
    %21 = math.exp %20 : vector<8x8xf32>
    %c0_12 = arith.constant 0 : index
    %c0_13 = arith.constant 0 : index
    %22 = vector.load %arg9[%c0_12, %c0_13] : memref<8x128xf32, #tpu.memory_space<vmem>>, vector<8x1xf32>
    %23 = arith.mulf %18, %22 : vector<8x1xf32>
    %cst_14 = arith.constant dense<0.000000e+00> : vector<8xf32>
    %24 = vector.multi_reduction <add>, %21, %cst_14 [1] : vector<8x8xf32> to vector<8xf32>
    %25 = vector.shape_cast %24 : vector<8xf32> to vector<8x1xf32>
    %26 = arith.addf %23, %25 : vector<8x1xf32>
    %c0_15 = arith.constant 0 : index
    %c0_16 = arith.constant 0 : index
    %27 = vector.load %arg9[%c0_15, %c0_16] : memref<8x128xf32, #tpu.memory_space<vmem>>, vector<8x1xf32>
    tpu.vector_store %arg9[%c0_15, %c0_16], %26 {strides = array<i32>} : memref<8x128xf32, #tpu.memory_space<vmem>>, vector<8x1xf32>,
    %cst_17 = arith.constant dense<0.000000e+00> : vector<8x8xf32>
    %28 = tpu.matmul %21, %11, %cst_17 {dimension_numbers = #tpu.dot_dimension_numbers<[1], [0], [0], [1], [0, 0, 1, 1], [], []>} : vector<8x8xf32>, vector<8x8xf32>, vector<8x8xf32> -> vector<8x8xf32>
    %c0_18 = arith.constant 0 : index
    %c0_19 = arith.constant 0 : index
    %29 = vector.load %arg10[%c0_18, %c0_19] : memref<8x32xf32, #tpu.memory_space<vmem>>, vector<8x8xf32>
    %30 = vector.broadcast %18 : vector<8x1xf32> to vector<8x8xf32>
    %31 = arith.mulf %30, %29 : vector<8x8xf32>
    %32 = arith.addf %31, %28 : vector<8x8xf32>
    %c0_20 = arith.constant 0 : index
    %c0_21 = arith.constant 0 : index
    %33 = vector.load %arg10[%c0_20, %c0_21] : memref<8x32xf32, #tpu.memory_space<vmem>>, vector<8x8xf32>
    tpu.vector_store %arg10[%c0_20, %c0_21], %32 {strides = array<i32>} : memref<8x32xf32, #tpu.memory_space<vmem>>, vector<8x8xf32>,
    %c0_22 = arith.constant 0 : index
    %c0_23 = arith.constant 0 : index
    %34 = vector.load %arg8[%c0_22, %c0_23] : memref<8x128xf32, #tpu.memory_space<vmem>>, vector<8x1xf32>
    tpu.vector_store %arg8[%c0_22, %c0_23], %16 {strides = array<i32>} : memref<8x128xf32, #tpu.memory_space<vmem>>, vector<8x1xf32>,
    %35 = vector.extract_strided_slice %4 {offsets = [0, 8], sizes = [8, 8], strides = [1, 1]} : vector<8x32xf32> to vector<8x8xf32>
    %36 = vector.extract_strided_slice %6 {offsets = [0, 8], sizes = [8, 8], strides = [1, 1]} : vector<8x32xf32> to vector<8x8xf32>
    %37 = vector.extract_strided_slice %8 {offsets = [0, 8], sizes = [8, 8], strides = [1, 1]} : vector<8x32xf32> to vector<8x8xf32>
    %cst_24 = arith.constant dense<0.000000e+00> : vector<8x8xf32>
    %38 = tpu.matmul %35, %36, %cst_24 {dimension_numbers = #tpu.dot_dimension_numbers<[1], [1], [0], [0], [0, 0, 1, 0], [], []>} : vector<8x8xf32>, vector<8x8xf32>, vector<8x8xf32> -> vector<8x8xf32>
    %c0_25 = arith.constant 0 : index
    %c1 = arith.constant 1 : index
    %39 = vector.load %arg8[%c0_25, %c1] : memref<8x128xf32, #tpu.memory_space<vmem>>, vector<8x1xf32>
    %cst_26 = arith.constant dense<0xFF800000> : vector<8xf32>
    %40 = vector.multi_reduction <maximumf>, %38, %cst_26 [1] : vector<8x8xf32> to vector<8xf32>
    %41 = vector.shape_cast %40 : vector<8xf32> to vector<8x1xf32>
    %42 = arith.maximumf %39, %41 : vector<8x1xf32>
    %43 = arith.subf %39, %42 : vector<8x1xf32>
    %44 = math.exp %43 : vector<8x1xf32>
    %45 = vector.broadcast %42 : vector<8x1xf32> to vector<8x8xf32>
    %46 = arith.subf %38, %45 : vector<8x8xf32>
    %47 = math.exp %46 : vector<8x8xf32>
    %c0_27 = arith.constant 0 : index
    %c1_28 = arith.constant 1 : index
    %48 = vector.load %arg9[%c0_27, %c1_28] : memref<8x128xf32, #tpu.memory_space<vmem>>, vector<8x1xf32>
    %49 = arith.mulf %44, %48 : vector<8x1xf32>
    %cst_29 = arith.constant dense<0.000000e+00> : vector<8xf32>
    %50 = vector.multi_reduction <add>, %47, %cst_29 [1] : vector<8x8xf32> to vector<8xf32>
    %51 = vector.shape_cast %50 : vector<8xf32> to vector<8x1xf32>
    %52 = arith.addf %49, %51 : vector<8x1xf32>
    %c0_30 = arith.constant 0 : index
    %c1_31 = arith.constant 1 : index
    %53 = vector.load %arg9[%c0_30, %c1_31] : memref<8x128xf32, #tpu.memory_space<vmem>>, vector<8x1xf32>
    tpu.vector_store %arg9[%c0_30, %c1_31], %52 {strides = array<i32>} : memref<8x128xf32, #tpu.memory_space<vmem>>, vector<8x1xf32>,
    %cst_32 = arith.constant dense<0.000000e+00> : vector<8x8xf32>
    %54 = tpu.matmul %47, %37, %cst_32 {dimension_numbers = #tpu.dot_dimension_numbers<[1], [0], [0], [1], [0, 0, 1, 1], [], []>} : vector<8x8xf32>, vector<8x8xf32>, vector<8x8xf32> -> vector<8x8xf32>
    %c0_33 = arith.constant 0 : index
    %c8 = arith.constant 8 : index
    %55 = vector.load %arg10[%c0_33, %c8] : memref<8x32xf32, #tpu.memory_space<vmem>>, vector<8x8xf32>
    %56 = vector.broadcast %44 : vector<8x1xf32> to vector<8x8xf32>
    %57 = arith.mulf %56, %55 : vector<8x8xf32>
    %58 = arith.addf %57, %54 : vector<8x8xf32>
    %c0_34 = arith.constant 0 : index
    %c8_35 = arith.constant 8 : index
    %59 = vector.load %arg10[%c0_34, %c8_35] : memref<8x32xf32, #tpu.memory_space<vmem>>, vector<8x8xf32>
    tpu.vector_store %arg10[%c0_34, %c8_35], %58 {strides = array<i32>} : memref<8x32xf32, #tpu.memory_space<vmem>>, vector<8x8xf32>,
    %c0_36 = arith.constant 0 : index
    %c1_37 = arith.constant 1 : index
    %60 = vector.load %arg8[%c0_36, %c1_37] : memref<8x128xf32, #tpu.memory_space<vmem>>, vector<8x1xf32>
    tpu.vector_store %arg8[%c0_36, %c1_37], %42 {strides = array<i32>} : memref<8x128xf32, #tpu.memory_space<vmem>>, vector<8x1xf32>,
    %61 = vector.extract_strided_slice %4 {offsets = [0, 16], sizes = [8, 8], strides = [1, 1]} : vector<8x32xf32> to vector<8x8xf32>
    %62 = vector.extract_strided_slice %6 {offsets = [0, 16], sizes = [8, 8], strides = [1, 1]} : vector<8x32xf32> to vector<8x8xf32>
    %63 = vector.extract_strided_slice %8 {offsets = [0, 16], sizes = [8, 8], strides = [1, 1]} : vector<8x32xf32> to vector<8x8xf32>
    %cst_38 = arith.constant dense<0.000000e+00> : vector<8x8xf32>
    %64 = tpu.matmul %61, %62, %cst_38 {dimension_numbers = #tpu.dot_dimension_numbers<[1], [1], [0], [0], [0, 0, 1, 0], [], []>} : vector<8x8xf32>, vector<8x8xf32>, vector<8x8xf32> -> vector<8x8xf32>
    %c0_39 = arith.constant 0 : index
    %c2 = arith.constant 2 : index
    %65 = vector.load %arg8[%c0_39, %c2] : memref<8x128xf32, #tpu.memory_space<vmem>>, vector<8x1xf32>
    %cst_40 = arith.constant dense<0xFF800000> : vector<8xf32>
    %66 = vector.multi_reduction <maximumf>, %64, %cst_40 [1] : vector<8x8xf32> to vector<8xf32>
    %67 = vector.shape_cast %66 : vector<8xf32> to vector<8x1xf32>
    %68 = arith.maximumf %65, %67 : vector<8x1xf32>
    %69 = arith.subf %65, %68 : vector<8x1xf32>
    %70 = math.exp %69 : vector<8x1xf32>
    %71 = vector.broadcast %68 : vector<8x1xf32> to vector<8x8xf32>
    %72 = arith.subf %64, %71 : vector<8x8xf32>
    %73 = math.exp %72 : vector<8x8xf32>
    %c0_41 = arith.constant 0 : index
    %c2_42 = arith.constant 2 : index
    %74 = vector.load %arg9[%c0_41, %c2_42] : memref<8x128xf32, #tpu.memory_space<vmem>>, vector<8x1xf32>
    %75 = arith.mulf %70, %74 : vector<8x1xf32>
    %cst_43 = arith.constant dense<0.000000e+00> : vector<8xf32>
    %76 = vector.multi_reduction <add>, %73, %cst_43 [1] : vector<8x8xf32> to vector<8xf32>
    %77 = vector.shape_cast %76 : vector<8xf32> to vector<8x1xf32>
    %78 = arith.addf %75, %77 : vector<8x1xf32>
    %c0_44 = arith.constant 0 : index
    %c2_45 = arith.constant 2 : index
    %79 = vector.load %arg9[%c0_44, %c2_45] : memref<8x128xf32, #tpu.memory_space<vmem>>, vector<8x1xf32>
    tpu.vector_store %arg9[%c0_44, %c2_45], %78 {strides = array<i32>} : memref<8x128xf32, #tpu.memory_space<vmem>>, vector<8x1xf32>,
    %cst_46 = arith.constant dense<0.000000e+00> : vector<8x8xf32>
    %80 = tpu.matmul %73, %63, %cst_46 {dimension_numbers = #tpu.dot_dimension_numbers<[1], [0], [0], [1], [0, 0, 1, 1], [], []>} : vector<8x8xf32>, vector<8x8xf32>, vector<8x8xf32> -> vector<8x8xf32>
    %c0_47 = arith.constant 0 : index
    %c16 = arith.constant 16 : index
    %81 = vector.load %arg10[%c0_47, %c16] : memref<8x32xf32, #tpu.memory_space<vmem>>, vector<8x8xf32>
    %82 = vector.broadcast %70 : vector<8x1xf32> to vector<8x8xf32>
    %83 = arith.mulf %82, %81 : vector<8x8xf32>
    %84 = arith.addf %83, %80 : vector<8x8xf32>
    %c0_48 = arith.constant 0 : index
    %c16_49 = arith.constant 16 : index
    %85 = vector.load %arg10[%c0_48, %c16_49] : memref<8x32xf32, #tpu.memory_space<vmem>>, vector<8x8xf32>
    tpu.vector_store %arg10[%c0_48, %c16_49], %84 {strides = array<i32>} : memref<8x32xf32, #tpu.memory_space<vmem>>, vector<8x8xf32>,
    %c0_50 = arith.constant 0 : index
    %c2_51 = arith.constant 2 : index
    %86 = vector.load %arg8[%c0_50, %c2_51] : memref<8x128xf32, #tpu.memory_space<vmem>>, vector<8x1xf32>
    tpu.vector_store %arg8[%c0_50, %c2_51], %68 {strides = array<i32>} : memref<8x128xf32, #tpu.memory_space<vmem>>, vector<8x1xf32>,
    %87 = vector.extract_strided_slice %4 {offsets = [0, 24], sizes = [8, 8], strides = [1, 1]} : vector<8x32xf32> to vector<8x8xf32>
    %88 = vector.extract_strided_slice %6 {offsets = [0, 24], sizes = [8, 8], strides = [1, 1]} : vector<8x32xf32> to vector<8x8xf32>
    %89 = vector.extract_strided_slice %8 {offsets = [0, 24], sizes = [8, 8], strides = [1, 1]} : vector<8x32xf32> to vector<8x8xf32>
    %cst_52 = arith.constant dense<0.000000e+00> : vector<8x8xf32>
    %90 = tpu.matmul %87, %88, %cst_52 {dimension_numbers = #tpu.dot_dimension_numbers<[1], [1], [0], [0], [0, 0, 1, 0], [], []>} : vector<8x8xf32>, vector<8x8xf32>, vector<8x8xf32> -> vector<8x8xf32>
    %c0_53 = arith.constant 0 : index
    %c3 = arith.constant 3 : index
    %91 = vector.load %arg8[%c0_53, %c3] : memref<8x128xf32, #tpu.memory_space<vmem>>, vector<8x1xf32>
    %cst_54 = arith.constant dense<0xFF800000> : vector<8xf32>
    %92 = vector.multi_reduction <maximumf>, %90, %cst_54 [1] : vector<8x8xf32> to vector<8xf32>
    %93 = vector.shape_cast %92 : vector<8xf32> to vector<8x1xf32>
    %94 = arith.maximumf %91, %93 : vector<8x1xf32>
    %95 = arith.subf %91, %94 : vector<8x1xf32>
    %96 = math.exp %95 : vector<8x1xf32>
    %97 = vector.broadcast %94 : vector<8x1xf32> to vector<8x8xf32>
    %98 = arith.subf %90, %97 : vector<8x8xf32>
    %99 = math.exp %98 : vector<8x8xf32>
    %c0_55 = arith.constant 0 : index
    %c3_56 = arith.constant 3 : index
    %100 = vector.load %arg9[%c0_55, %c3_56] : memref<8x128xf32, #tpu.memory_space<vmem>>, vector<8x1xf32>
    %101 = arith.mulf %96, %100 : vector<8x1xf32>
    %cst_57 = arith.constant dense<0.000000e+00> : vector<8xf32>
    %102 = vector.multi_reduction <add>, %99, %cst_57 [1] : vector<8x8xf32> to vector<8xf32>
    %103 = vector.shape_cast %102 : vector<8xf32> to vector<8x1xf32>
    %104 = arith.addf %101, %103 : vector<8x1xf32>
    %c0_58 = arith.constant 0 : index
    %c3_59 = arith.constant 3 : index
    %105 = vector.load %arg9[%c0_58, %c3_59] : memref<8x128xf32, #tpu.memory_space<vmem>>, vector<8x1xf32>
    tpu.vector_store %arg9[%c0_58, %c3_59], %104 {strides = array<i32>} : memref<8x128xf32, #tpu.memory_space<vmem>>, vector<8x1xf32>,
    %cst_60 = arith.constant dense<0.000000e+00> : vector<8x8xf32>
    %106 = tpu.matmul %99, %89, %cst_60 {dimension_numbers = #tpu.dot_dimension_numbers<[1], [0], [0], [1], [0, 0, 1, 1], [], []>} : vector<8x8xf32>, vector<8x8xf32>, vector<8x8xf32> -> vector<8x8xf32>
    %c0_61 = arith.constant 0 : index
    %c24 = arith.constant 24 : index
    %107 = vector.load %arg10[%c0_61, %c24] : memref<8x32xf32, #tpu.memory_space<vmem>>, vector<8x8xf32>
    %108 = vector.broadcast %96 : vector<8x1xf32> to vector<8x8xf32>
    %109 = arith.mulf %108, %107 : vector<8x8xf32>
    %110 = arith.addf %109, %106 : vector<8x8xf32>
    %c0_62 = arith.constant 0 : index
    %c24_63 = arith.constant 24 : index
    %111 = vector.load %arg10[%c0_62, %c24_63] : memref<8x32xf32, #tpu.memory_space<vmem>>, vector<8x8xf32>
    tpu.vector_store %arg10[%c0_62, %c24_63], %110 {strides = array<i32>} : memref<8x32xf32, #tpu.memory_space<vmem>>, vector<8x8xf32>,
    %c0_64 = arith.constant 0 : index
    %c3_65 = arith.constant 3 : index
    %112 = vector.load %arg8[%c0_64, %c3_65] : memref<8x128xf32, #tpu.memory_space<vmem>>, vector<8x1xf32>
    tpu.vector_store %arg8[%c0_64, %c3_65], %94 {strides = array<i32>} : memref<8x128xf32, #tpu.memory_space<vmem>>, vector<8x1xf32>,
    %c0_i32_66 = arith.constant 0 : i32
    %113 = arith.cmpi eq, %arg3, %c0_i32_66 : i32
    %114 = arith.extui %113 : i1 to i32
    %c0_i32_67 = arith.constant 0 : i32
    %115 = arith.cmpi ne, %114, %c0_i32_67 : i32
    scf.if %115 {
      %c0_68 = arith.constant 0 : index
      %c0_69 = arith.constant 0 : index
      %116 = vector.load %arg9[%c0_68, %c0_69] : memref<8x128xf32, #tpu.memory_space<vmem>>, vector<8x1xf32>
      %117 = tpu.reciprocal %116 {approx = true} : vector<8x1xf32> -> vector<8x1xf32>
      %c0_70 = arith.constant 0 : index
      %c0_71 = arith.constant 0 : index
      %118 = vector.load %arg10[%c0_70, %c0_71] : memref<8x32xf32, #tpu.memory_space<vmem>>, vector<8x8xf32>
      %119 = vector.broadcast %117 : vector<8x1xf32> to vector<8x8xf32>
      %120 = arith.mulf %118, %119 : vector<8x8xf32>
      %c0_72 = arith.constant 0 : index
      %c0_73 = arith.constant 0 : index
      %121 = vector.load %arg10[%c0_72, %c0_73] : memref<8x32xf32, #tpu.memory_space<vmem>>, vector<8x8xf32>
      tpu.vector_store %arg10[%c0_72, %c0_73], %120 {strides = array<i32>} : memref<8x32xf32, #tpu.memory_space<vmem>>, vector<8x8xf32>,
      %c0_74 = arith.constant 0 : index
      %c1_75 = arith.constant 1 : index
      %122 = vector.load %arg9[%c0_74, %c1_75] : memref<8x128xf32, #tpu.memory_space<vmem>>, vector<8x1xf32>
      %123 = tpu.reciprocal %122 {approx = true} : vector<8x1xf32> -> vector<8x1xf32>
      %c0_76 = arith.constant 0 : index
      %c8_77 = arith.constant 8 : index
      %124 = vector.load %arg10[%c0_76, %c8_77] : memref<8x32xf32, #tpu.memory_space<vmem>>, vector<8x8xf32>
      %125 = vector.broadcast %123 : vector<8x1xf32> to vector<8x8xf32>
      %126 = arith.mulf %124, %125 : vector<8x8xf32>
      %c0_78 = arith.constant 0 : index
      %c8_79 = arith.constant 8 : index
      %127 = vector.load %arg10[%c0_78, %c8_79] : memref<8x32xf32, #tpu.memory_space<vmem>>, vector<8x8xf32>
      tpu.vector_store %arg10[%c0_78, %c8_79], %126 {strides = array<i32>} : memref<8x32xf32, #tpu.memory_space<vmem>>, vector<8x8xf32>,
      %c0_80 = arith.constant 0 : index
      %c2_81 = arith.constant 2 : index
      %128 = vector.load %arg9[%c0_80, %c2_81] : memref<8x128xf32, #tpu.memory_space<vmem>>, vector<8x1xf32>
      %129 = tpu.reciprocal %128 {approx = true} : vector<8x1xf32> -> vector<8x1xf32>
      %c0_82 = arith.constant 0 : index
      %c16_83 = arith.constant 16 : index
      %130 = vector.load %arg10[%c0_82, %c16_83] : memref<8x32xf32, #tpu.memory_space<vmem>>, vector<8x8xf32>
      %131 = vector.broadcast %129 : vector<8x1xf32> to vector<8x8xf32>
      %132 = arith.mulf %130, %131 : vector<8x8xf32>
      %c0_84 = arith.constant 0 : index
      %c16_85 = arith.constant 16 : index
      %133 = vector.load %arg10[%c0_84, %c16_85] : memref<8x32xf32, #tpu.memory_space<vmem>>, vector<8x8xf32>
      tpu.vector_store %arg10[%c0_84, %c16_85], %132 {strides = array<i32>} : memref<8x32xf32, #tpu.memory_space<vmem>>, vector<8x8xf32>,
      %c0_86 = arith.constant 0 : index
      %c3_87 = arith.constant 3 : index
      %134 = vector.load %arg9[%c0_86, %c3_87] : memref<8x128xf32, #tpu.memory_space<vmem>>, vector<8x1xf32>
      %135 = tpu.reciprocal %134 {approx = true} : vector<8x1xf32> -> vector<8x1xf32>
      %c0_88 = arith.constant 0 : index
      %c24_89 = arith.constant 24 : index
      %136 = vector.load %arg10[%c0_88, %c24_89] : memref<8x32xf32, #tpu.memory_space<vmem>>, vector<8x8xf32>
      %137 = vector.broadcast %135 : vector<8x1xf32> to vector<8x8xf32>
      %138 = arith.mulf %136, %137 : vector<8x8xf32>
      %c0_90 = arith.constant 0 : index
      %c24_91 = arith.constant 24 : index
      %139 = vector.load %arg10[%c0_90, %c24_91] : memref<8x32xf32, #tpu.memory_space<vmem>>, vector<8x8xf32>
      tpu.vector_store %arg10[%c0_90, %c24_91], %138 {strides = array<i32>} : memref<8x32xf32, #tpu.memory_space<vmem>>, vector<8x8xf32>,
      %c0_92 = arith.constant 0 : index
      %c0_93 = arith.constant 0 : index
      %140 = vector.load %arg10[%c0_92, %c0_93] : memref<8x32xf32, #tpu.memory_space<vmem>>, vector<8x32xf32>
      %c0_94 = arith.constant 0 : index
      %c0_95 = arith.constant 0 : index
      %c0_96 = arith.constant 0 : index
      %141 = vector.load %arg7[%c0_94, %c0_95, %c0_96] : memref<1x8x32xf32, #tpu.memory_space<vmem>>, vector<1x8x32xf32>
      %142 = vector.shape_cast %141 : vector<1x8x32xf32> to vector<8x32xf32>
      %143 = vector.shape_cast %140 : vector<8x32xf32> to vector<1x8x32xf32>
      tpu.vector_store %arg7[%c0_94, %c0_95, %c0_96], %143 {strides = array<i32>} : memref<1x8x32xf32, #tpu.memory_space<vmem>>, vector<1x8x32xf32>,
    } else {
    }
    return
  }
  func.func @transform_0(%arg0: i32, %arg1: i32, %arg2: i32, %arg3: i32) -> (i32, i32, i32) {
    %c0_i32 = arith.constant 0 : i32
    return %arg0, %arg2, %arg1 : i32, i32, i32
  }
  func.func @transform_1(%arg0: i32, %arg1: i32, %arg2: i32, %arg3: i32) -> (i32, i32, i32) {
    %c0_i32 = arith.constant 0 : i32
    return %arg0, %arg3, %arg1 : i32, i32, i32
  }
  func.func @transform_2(%arg0: i32, %arg1: i32, %arg2: i32, %arg3: i32) -> (i32, i32, i32) {
    %c0_i32 = arith.constant 0 : i32
    return %arg0, %arg3, %arg1 : i32, i32, i32
  }
  func.func @transform_3(%arg0: i32, %arg1: i32, %arg2: i32, %arg3: i32) -> (i32, i32, i32) {
    %c0_i32 = arith.constant 0 : i32
    return %arg0, %arg2, %arg1 : i32, i32, i32
  }
}

</mosaic_0001>

<bundles_post_ra>
// kernel: m2m100_attention_forward.5
= control target key start
LH: loop header
LB: loop body
LE: loop exit
PB: predicated region body
PF: predicated region fallthrough
CT: control target
= control target key end

     0   :  { %8 = vsyncpa [#allocation3], 0  ;;  %s204_s0 = inlined_call_operand.vmem [shape: f32[16,32], index: 0, kind: input, shape index: {}]   ;;  %s205_s1 = inlined_call_operand.hbm [shape: f32[32,32], index: 1, kind: input, shape index: {}]   ;;  %s206_s2 = inlined_call_operand.vmem [shape: f32[1,32], index: 2, kind: input, shape index: {}]   ;;  %s207_s3 = inlined_call_operand.hbm [shape: f32[16,32], index: 3, kind: output, shape index: {}]  }
   0x1   :  { %9 = vsyncpa [#allocation4], 0  ;;  %s16_s14 = sshll.u32 %s205_s1, 4  ;;  %s155_s15 = smov [#allocation2]   ;;  %s17_s14 = int_to_ptr.hbm [resolvable:$true] %s16_s14 }
   0x2   :  { %s18_s16 = sshll.u32 %s155_s15, 4  ;;  %s156_s17 = smov 128   ;;  %s19_s16 = int_to_ptr.vmem [resolvable:$true] %s18_s16 }
   0x3   :  { %s157_s18 = smov 8  }
   0x4   :  { %24 = dma.hbm_to_vmem [thread:$0]  %s17_s14, 512, %s19_s16, [#allocation3], %s156_s17, %s156_s17, %s157_s18  }
   0x5   :  { %151 = dma.done.wait [#allocation3], 512  }
   0x6   :  { %152 = vsyncadd [#allocation3], 4294966784  ;;  %v36_v0 = vld [vmem:[#allocation2 + $0x18] sm:$0xff]  ;;  %v35_v1 = vld [vmem:[#allocation2 + $0x10] sm:$0xff]  ;;  %vm41_vm0 = vcmask 261120   ;;  %s158_s24 = smov [#allocation5]  }
   0x7   :  { %60 = vmatpush.msra.mxu0 %v36_v0  ;;  %94 = vmatpush.msra.mxu1 %v36_v0  ;;  %v34_v2 = vld [vmem:[#allocation2 + $0x8] sm:$0xff]  ;;  %v33_v3 = vld [vmem:[#allocation2] sm:$0xff]  ;;  %s77_s25 = sshll.u32 %s158_s24, 4  ;;  %s79_s28 = sshll.u32 %s207_s3, 4  ;;  %s78_s25 = int_to_ptr.vmem [resolvable:$true] %s77_s25  ;;  %s80_s28 = int_to_ptr.hbm [resolvable:$true] %s79_s28 }
   0x8   :  { %v31_v4 = vld [vmem:[%s204_s0] sm:$0xff]  ;;  %v32_v5 = vld [vmem:[%s204_s0 + $0x8] sm:$0xff] }
   0x9   :  { %61 = vmatpush.msra.mxu0 %v35_v1  ;;  %95 = vmatpush.msra.mxu1 %v35_v1  ;;  %v102_v6 = vld [vmem:[%s206_s2] ss:$0 sm:$0xff] }
   0xb   :  { %62 = vmatpush.msra.mxu0 %v34_v2  ;;  %96 = vmatpush.msra.mxu1 %v34_v2 }
   0xd   :  { %63 = vmatpush.msra.mxu0 %v33_v3  ;;  %97 = vmatpush.msra.mxu1 %v33_v3 }
   0xe   :  { %92 = vmatmul.msk.f32.vlgmr.msra.gmra.mxu0 %vm41_vm0, %v31_v4  ;;  %93 = vmatmul.msk.f32.vlgmr.msra.gmra.mxu1 %vm41_vm0, %v32_v5 }
  0x8b   :  { %v65_v7 = vpop.f32.mrf.mxu0  ;;  %v68_v8 = vpop.f32.mrf.mxu1 }
  0x8c   :  { %v66_v9 = vadd.f32 %v102_v6, %v65_v7  ;;  %v69_v10 = vadd.f32 %v102_v6, %v68_v8 }
  0x8e   :  { %71 = vst.msk [vmem:[#allocation5] sm:$0xff] %vm41_vm0, %v66_v9 }
  0x8f   :  { %72 = vst.msk [vmem:[#allocation5 + $0x8] sm:$0xff] %vm41_vm0, %v69_v10 }
  0x90   :  { %85 = dma.vmem_to_hbm [thread:$0]  %s78_s25, 256, %s80_s28, [#allocation4], %s156_s17, %s156_s17, %s157_s18  }
  0x91   :  { %153 = dma.done.wait [#allocation4], 256  }
  0x92   :  { %154 = vsyncadd [#allocation4], 4294967040 }
  0x93   :  { %90 = vsyncpa [#allocation3], 1 }
  0x94   :  { %91 = vsyncpa [#allocation4], 1 }

// kernel: m2m100_attention_forward.3
= control target key start
LH: loop header
LB: loop body
LE: loop exit
PB: predicated region body
PF: predicated region fallthrough
CT: control target
= control target key end

     0   :  { %15 = vsyncpa [#allocation3], 0  ;;  %s482_s0 = inlined_call_operand.hbm [shape: f32[16,32], index: 0, kind: input, shape index: {}]   ;;  %s483_s1 = inlined_call_operand.hbm [shape: f32[32,32], index: 1, kind: input, shape index: {}]   ;;  %s484_s2 = inlined_call_operand.hbm [shape: f32[32,32], index: 2, kind: input, shape index: {}]   ;;  %s485_s3 = inlined_call_operand.hbm [shape: f32[32,32], index: 3, kind: input, shape index: {}]   ;;  %s486_s4 = inlined_call_operand.vmem [shape: f32[1,32], index: 4, kind: input, shape index: {}]   ;;  %s487_s5 = inlined_call_operand.hbm [shape: f32[1,32], index: 5, kind: input, shape index: {}]   ;;  %s488_s6 = inlined_call_operand.vmem [shape: f32[1,32], index: 6, kind: input, shape index: {}]   ;;  %s489_s7 = inlined_call_operand.vmem [shape: f32[16,32], index: 7, kind: output, shape index: {0}]   ;;  %s490_s8 = inlined_call_operand.vmem [shape: f32[16,32], index: 8, kind: output, shape index: {1}]   ;;  %s491_s9 = inlined_call_operand.vmem [shape: f32[16,32], index: 9, kind: output, shape index: {2}]  }
   0x1   :  { %16 = vsyncpa [#allocation5], 0 }
   0x2   :  { %17 = vsyncpa [#allocation8], 0  ;;  %s35_s11 = sshll.u32 %s483_s1, 4  ;;  %s374_s12 = smov [#allocation4]   ;;  %s36_s11 = int_to_ptr.hbm [resolvable:$true] %s35_s11 }
   0x3   :  { %s37_s13 = sshll.u32 %s374_s12, 4  ;;  %s61_s16 = sshll.u32 %s485_s3, 4  ;;  %s38_s13 = int_to_ptr.vmem [resolvable:$true] %s37_s13  ;;  %s62_s16 = int_to_ptr.hbm [resolvable:$true] %s61_s16 }
   0x4   :  { %s375_s17 = smov 128   ;;  %s376_s18 = smov 8  }
   0x5   :  { %43 = dma.hbm_to_vmem [thread:$0]  %s36_s11, 512, %s38_s13, [#allocation5], %s375_s17, %s375_s17, %s376_s18  }
   0x6   :  { %s377_s19 = smov [#allocation7]   ;;  %s22_s23 = sshll.u32 %s482_s0, 4  ;;  %s23_s23 = int_to_ptr.hbm [resolvable:$true] %s22_s23 }
   0x7   :  { %s63_s20 = sshll.u32 %s377_s19, 4  ;;  %s48_s25 = sshll.u32 %s484_s2, 4  ;;  %s64_s20 = int_to_ptr.vmem [resolvable:$true] %s63_s20  ;;  %s49_s25 = int_to_ptr.hbm [resolvable:$true] %s48_s25 }
   0x8   :  { %69 = dma.hbm_to_vmem [thread:$0]  %s62_s16, 512, %s64_s20, [#allocation8], %s375_s17, %s375_s17, %s376_s18  }
   0x9   :  { %s378_s26 = smov [#allocation2]   ;;  %s379_s3 = smov [#allocation6]  }
   0xa   :  { %s24_s27 = sshll.u32 %s378_s26, 4  ;;  %s50_s28 = sshll.u32 %s379_s3, 4  ;;  %s25_s27 = int_to_ptr.vmem [resolvable:$true] %s24_s27  ;;  %s51_s28 = int_to_ptr.vmem [resolvable:$true] %s50_s28 }
   0xb   :  { %30 = dma.hbm_to_vmem [thread:$0]  %s23_s23, 256, %s25_s27, [#allocation3], %s375_s17, %s375_s17, %s376_s18  }
   0xc   :  { %s77_s10 = sshll.u32 %s487_s5, 4  ;;  %s380_s0 = smov [#allocation9]   ;;  %s78_s10 = int_to_ptr.hbm [resolvable:$true] %s77_s10 }
   0xd   :  { %56 = dma.hbm_to_vmem [thread:$0]  %s49_s25, 512, %s51_s28, [#allocation5], %s375_s17, %s375_s17, %s376_s18  }
   0xe   :  { %s79_s11 = sshll.u32 %s380_s0, 4  ;;  %s80_s11 = int_to_ptr.vmem [resolvable:$true] %s79_s11 }
   0xf   :  { %82 = dma.hbm_to_vmem [thread:$0]  %s78_s10, 16, %s80_s11, [#allocation8]  }
  0x10   :  { %368 = dma.done.wait [#allocation3], 256  }
  0x11   :  { %369 = vsyncadd [#allocation3], 4294967040 }
  0x12   :  { %370 = dma.done.wait [#allocation5], 1024  }
  0x13   :  { %371 = vsyncadd [#allocation5], 4294966272 }
  0x14   :  { %372 = dma.done.wait [#allocation8], 528  }
  0x15   :  { %373 = vsyncadd [#allocation8], 4294966768  ;;  %v183_v0 = vld [vmem:[#allocation7 + $0x18] sm:$0xff]  ;;  %v182_v1 = vld [vmem:[#allocation7 + $0x10] sm:$0xff]  ;;  %vm115_vm0 = vcmask 261120  }
  0x16   :  { %200 = vmatpush.msra.mxu2 %v183_v0  ;;  %v181_v2 = vld [vmem:[#allocation7 + $0x8] sm:$0xff]  ;;  %v150_v3 = vld [vmem:[#allocation6 + $0x18] sm:$0xff]  ;;  %v149_v5 = vld [vmem:[#allocation6 + $0x10] sm:$0xff] }
  0x17   :  { %167 = vmatpush.msra.mxu1 %v150_v3  ;;  %v110_v4 = vld [vmem:[#allocation4 + $0x18] sm:$0xff]  ;;  %v109_v6 = vld [vmem:[#allocation4 + $0x10] sm:$0xff]  ;;  %v180_v7 = vld [vmem:[#allocation7] sm:$0xff] }
  0x18   :  { %201 = vmatpush.msra.mxu2 %v182_v1  ;;  %234 = vmatpush.msra.mxu3 %v110_v4  ;;  %v148_v8 = vld [vmem:[#allocation6 + $0x8] sm:$0xff]  ;;  %v105_v9 = vld [vmem:[#allocation2] sm:$0xff]  ;;  %v147_v11 = vld [vmem:[#allocation6] sm:$0xff] }
  0x19   :  { %168 = vmatpush.msra.mxu1 %v149_v5  ;;  %v108_v10 = vld [vmem:[#allocation4 + $0x8] sm:$0xff]  ;;  %134 = vmatpush.msra.mxu0 %v110_v4  ;;  %v107_v12 = vld [vmem:[#allocation4] sm:$0xff]  ;;  %v106_v13 = vld [vmem:[#allocation2 + $0x8] sm:$0xff] }
  0x1a   :  { %202 = vmatpush.msra.mxu2 %v181_v2  ;;  %235 = vmatpush.msra.mxu3 %v109_v6  ;;  %v245_v14 = vld [vmem:[#allocation9] ss:$0 sm:$0xff]  ;;  %v247_v17 = vld [vmem:[%s486_s4] ss:$0 sm:$0xff] }
  0x1b   :  { %169 = vmatpush.msra.mxu1 %v148_v8  ;;  %135 = vmatpush.msra.mxu0 %v109_v6  ;;  %v246_v18 = vld [vmem:[%s488_s6] ss:$0 sm:$0xff] }
  0x1c   :  { %203 = vmatpush.msra.mxu2 %v180_v7  ;;  %236 = vmatpush.msra.mxu3 %v108_v10 }
  0x1d   :  { %232 = vmatmul.msk.f32.vlgmr.msra.gmra.mxu2 %vm115_vm0, %v105_v9  ;;  %170 = vmatpush.msra.mxu1 %v147_v11 }
  0x1e   :  { %230 = vmatmul.msk.f32.vlgmr.msra.gmra.mxu1 %vm115_vm0, %v105_v9  ;;  %237 = vmatpush.msra.mxu3 %v107_v12 }
  0x1f   :  { %229 = vmatmul.msk.f32.vlgmr.msra.gmra.mxu3 %vm115_vm0, %v106_v13  ;;  %136 = vmatpush.msra.mxu0 %v108_v10 }
  0x21   :  { %137 = vmatpush.msra.mxu0 %v107_v12 }
  0x22   :  { %228 = vmatmul.msk.f32.vlgmr.msra.gmra.mxu0 %vm115_vm0, %v105_v9 }
  0x25   :  { %233 = vmatmul.msk.f32.gmra.mxu2 %vm115_vm0, %v106_v13 }
  0x26   :  { %231 = vmatmul.msk.f32.gmra.mxu1 %vm115_vm0, %v106_v13 }
  0x9b   :  { %v172_v15 = vpop.f32.mrf.mxu1 }
  0x9c   :  { %v173_v16 = vadd.f32 %v245_v14, %v172_v15 }
  0x9e   :  { %178 = vst.msk [vmem:[%s490_s8] sm:$0xff] %vm115_vm0, %v173_v16 }
  0x9f   :  { %v139_v19 = vpop.f32.mrf.mxu0 }
  0xa0   :  { %v205_v20 = vpop.f32.mrf.mxu2  ;;  %v140_v21 = vadd.f32 %v247_v17, %v139_v19 }
  0xa1   :  { %v206_v22 = vadd.f32 %v246_v18, %v205_v20 }
  0xa2   :  { %145 = vst.msk [vmem:[%s489_s7] sm:$0xff] %vm115_vm0, %v140_v21  ;;  %v142_v23 = vpop.f32.mrf.mxu3 }
  0xa3   :  { %211 = vst.msk [vmem:[%s491_s9] sm:$0xff] %vm115_vm0, %v206_v22  ;;  %v143_v24 = vadd.f32 %v247_v17, %v142_v23  ;;  %v175_v25 = vpop.f32.mrf.mxu1 }
  0xa4   :  { %v176_v26 = vadd.f32 %v245_v14, %v175_v25 }
  0xa5   :  { %146 = vst.msk [vmem:[%s489_s7 + $0x8] sm:$0xff] %vm115_vm0, %v143_v24 }
  0xa6   :  { %179 = vst.msk [vmem:[%s490_s8 + $0x8] sm:$0xff] %vm115_vm0, %v176_v26 }
  0xa8   :  { %v208_v27 = vpop.f32.mrf.mxu2 }
  0xa9   :  { %v209_v28 = vadd.f32 %v246_v18, %v208_v27 }
  0xab   :  { %212 = vst.msk [vmem:[%s491_s9 + $0x8] sm:$0xff] %vm115_vm0, %v209_v28 }
  0xac   :  { %225 = vsyncpa [#allocation3], 1 }
  0xad   :  { %226 = vsyncpa [#allocation5], 1 }
  0xae   :  { %227 = vsyncpa [#allocation8], 1 }

// kernel: m2m100_attention_forward.4
= control target key start
LH: loop header
LB: loop body
LE: loop exit
PB: predicated region body
PF: predicated region fallthrough
CT: control target
= control target key end

     0   :  { %s1003_s12 = smov 0   ;;  %s1005_s13 = smov 0   ;;  %s1130_s0 = inlined_call_operand.vmem [shape: f32[2,8,32], index: 0, kind: input, shape index: {}]   ;;  %s1131_s1 = inlined_call_operand.vmem [shape: f32[2,8,32], index: 1, kind: input, shape index: {}]   ;;  %s1132_s2 = inlined_call_operand.vmem [shape: f32[2,8,32], index: 2, kind: input, shape index: {}]   ;;  %s1133_s3 = inlined_call_operand.vmem [shape: f32[2,8,32], index: 3, kind: output, shape index: {}]  }
   0x1   :  { %s1007_s14 = smov 0  }
   0x2 LB: > { %s39_s15 = sadd.s32 1, %s965_s13  ;;  %p862_p0 = scmp.ge.s32.totalorder %s969_s14, 1  ;;  %s969_s14 = sphi %s1007_s14, %s13_s14   ;;  %s965_s13 = sphi %s1005_s13, %s1135_s13   ;;  %s961_s12 = sphi %s1003_s12, %s1134_s12  }
   0x3   : > { %p41_p1 = scmp.ge.s32.totalorder %s39_s15, 2  ;;  %p214_p2 = scmp.lt.s32.totalorder %s969_s14, 3 }
   0x5   : > { %s1137_s15 = smov (%p41_p1, %s39_s15), 0  ;;  %p215_p3 = pnand %p862_p0, %p214_p2 }
   0x6   : > { %p268_p4 = scmp.lt.s32.totalorder (!%p215_p3), %s961_s12, 1  ;;  %s972_s23 = smov (!%p215_p3), 112  }
   0x7   : > { %218 = sbr.rel (%p215_p3) target bundleno = 1082 (0x43a), region = 32  ;;  %s973_s24 = smov (!%p215_p3), 120  }
   0x8   : > { %s974_s25 = smov (!%p215_p3), 104   ;;  %s980_s29 = smov (!%p215_p3), 8  }
   0x9   : > { %s981_s30 = smov (!%p215_p3), 16   ;;  %s982_s4 = smov (!%p215_p3), 24  }
   0xc   : > { %s1139_s12 = smov (!%p268_p4, %s961_s12), 1  ;;  %vm319_vm0 = vcmask 64512   ;;  %v971_v2 = vmov -inf   ;;  %v975_v5 = vmov 0   ;;  %v976_v6 = vmov 0.0  }
   0xd   : > { %s1021_s16 = sshll.u32 %s1139_s12, 3  ;;  %312 = vst [vmem:[#allocation2] sm:$0xff] %v971_v2  ;;  %917 = vset.pattern.permute.xlu1 %v975_v5  ;;  %vm368_vm1 = vcmask 7168   ;;  %v977_v26 = vmov 1   ;;  %v978_v27 = vmov 2   ;;  %v979_v28 = vmov 3  }
   0xe   : > { %s287_s19 = scalar_lea.vmem %s1131_s1, %s1021_s16  ;;  %s277_s22 = scalar_lea.vmem %s1130_s0, %s1021_s16  ;;  %313 = vst [vmem:[#allocation3] sm:$0xff] %v976_v6  ;;  %918 = vset.pattern.permute.xlu2 %v977_v26  ;;  %919 = vset.pattern.permute.xlu0 %v978_v27  ;;  %vm453_vm2 = vcmask 15368   ;;  %vm547_vm3 = vcmask 23568   ;;  %vm640_vm4 = vcmask 31768   ;;  %vm314_vm5 = vcmask 261120  }
   0xf   : > { %v317_v0 = vld [vmem:[%s287_s19] sm:$0xff]  ;;  %s297_s28 = scalar_lea.vmem %s1132_s2, %s1021_s16  ;;  %315 = vst.msk [vmem:[#allocation4] sm:$0xff] %vm314_vm5, %v976_v6  ;;  %vm494_vm6 = vcmask 130112   ;;  %vm587_vm7 = vcmask 195712   ;;  %vm680_vm8 = vcmask 261312   ;;  %s307_s7 = scalar_lea.vmem %s1133_s3, %s1021_s16 }
  0x10   : > { %867 = vmatpush.xpose.msk.msra.mxu0 %vm319_vm0, %v317_v0  ;;  %v316_v1 = vld [vmem:[%s277_s22] sm:$0xff]  ;;  %499 = vrot.lane.b32.xlu2 %v317_v0, %s972_s23 }
  0x11   : > { %v318_v9 = vld [vmem:[%s297_s28] sm:$0xff] }
  0x12   : > { %388 = vmatpush.msra.mxu1 %v318_v9 }
  0x13   : > { %868 = vmatmul.msk.f32.vlgmr.msra.gmra.mxu0 %vm319_vm0, %v316_v1 }
  0x16   : > { %v393_v53 = vld [vmem:[#allocation4] sm:$0xff] }
  0x18   : > { %497 = vrot.lane.b32.xlu2 %v316_v1, %s972_s23 }
  0x20   : > { %590 = vrot.lane.b32.xlu2 %v316_v1, %s974_s25 }
  0x6a   : > { %v500_v10 = vpop.permute.xlu2 %499 }
  0x6b   : > { %873 = vmatpush.xpose.msk.msrb.mxu1 %vm319_vm0, %v500_v10 }
  0x72   : > { %v498_v15 = vpop.permute.xlu2 %497 }
  0x7a   : > { %v591_v18 = vpop.permute.xlu2 %590 }
  0x90   : > { %v343_v3 = vpop.f32.mrf.mxu0 }
  0x91   : > { %v347_v4 = vsel %vm319_vm0, %v343_v3, -inf }
  0x92   : > { %348 = vmax.xlane.f32.xlu0 %v347_v4 }
  0xa6   : > { %405 = vrot.lane.b32.xlu0 %v317_v0, %s973_s24 }
 0x105   : > { %v349_v7 = vpop.xlane.xlu0 %348 }
 0x106   : > { %402 = vst.msk [vmem:[#allocation2] sm:$0xff] %vm368_vm1, %v349_v7  ;;  %356 = vperm.xlu1 %917, %v349_v7   ;;  %v351_v36 = vsub.f32 -inf, %v349_v7 }
 0x108   : > { %v352_v38 = vmul.f32 1.442695, %v351_v36 }
 0x10d   : > { %v1068_v29 = vld [vmem:[#allocation2] sm:$0xff] }
 0x10e   : > { %403 = vrot.lane.b32.xlu1 %v316_v1, %s973_s24 }
 0x10f   : > { %920 = vset.pattern.permute.xlu1 %v979_v28 }
 0x116   : > { %592 = vrot.lane.b32.xlu1 %v317_v0, %s974_s25 }
 0x118   : > { %v406_v8 = vpop.permute.xlu0 %405 }
 0x119   : > { %870 = vmatpush.xpose.msk.msra.mxu2 %vm319_vm0, %v406_v8 }
 0x178   : > { %v357_v11 = vpop.permute.xlu1 %356 }
 0x179   : > { %v359_v12 = vsub.f32 %v343_v3, %v357_v11 }
 0x17b   : > { %v360_v13 = vmul.f32 1.442695, %v359_v12 }
 0x17d   : > { %929 = vpow2.f32 %v360_v13 }
 0x17e   : > { %931 = vpow2.f32 %v352_v38 }
 0x180   : > { %v404_v14 = vpop.permute.xlu1 %403 }
 0x181   : > { %871 = vmatmul.msk.f32.vlgmr.msra.gmra.mxu2 %vm319_vm0, %v404_v14 }
 0x183   : > { %v930_v16 = vpop.eup %929 }
 0x184   : > { %869 = vmatmul.msk.f32.vlgmr.msra.gmra.mxu1 %vm319_vm0, %v930_v16  ;;  %v932_v43 = vpop.eup %931  ;;  %v364_v44 = vsel %vm319_vm0, %v930_v16, 0.0 }
 0x185   : > { %v363_v8 = vmul.f32 0.0, %v932_v43 }
 0x188   : > { %v593_v17 = vpop.permute.xlu1 %592 }
 0x189   : > { %876 = vmatpush.xpose.msk.msrb.mxu0 %vm319_vm0, %v593_v17 }
 0x18c   : > { %874 = vmatmul.msk.f32.vlgmr.msrb.gmra.mxu1 %vm319_vm0, %v498_v15  ;;  %877 = vmatmul.msk.f32.vlgmr.msrb.gmra.mxu0 %vm319_vm0, %v591_v18 }
 0x201   : > { %v1054_v19 = vpop.f32.mrf.mxu1 }
 0x204   : > { %v428_v20 = vpop.f32.mrf.mxu2 }
 0x205   : > { %v432_v21 = vsel %vm319_vm0, %v428_v20, -inf }
 0x206   : > { %433 = vmax.xlane.f32.xlu1 %v432_v21 }
 0x209   : > { %v1057_v22 = vpop.f32.mrf.mxu1  ;;  %v1059_v23 = vpop.f32.mrf.mxu0 }
 0x20a   : > { %v526_v24 = vsel %vm319_vm0, %v1057_v22, -inf  ;;  %v619_v25 = vsel %vm319_vm0, %v1059_v23, -inf }
 0x20b   : > { %527 = vmax.xlane.f32.xlu2 %v526_v24  ;;  %620 = vmax.xlane.f32.xlu0 %v619_v25 }
 0x21f   : > { %456 = vrot.lane.b32.xlu1 %v318_v9, %s973_s24 }
 0x279   : > { %v434_v30 = vpop.xlane.xlu1 %433 }
 0x27a   : > { %v1071_v31 = vmax.f32 %v1068_v29, %v434_v30 }
 0x27c   : > { %v436_v32 = vsub.f32 %v1068_v29, %v1071_v31  ;;  %496 = vst.msk [vmem:[#allocation2] sm:$0xff] %vm453_vm2, %v1071_v31  ;;  %441 = vperm.xlu2 %918, %v1071_v31  }
 0x27e   : > { %v528_v33 = vpop.xlane.xlu2 %527  ;;  %v621_v39 = vpop.xlane.xlu0 %620 }
 0x283   : > { %v525_v34 = vld [vmem:[#allocation2] sm:$0xff] }
 0x284   : > { %v529_v35 = vmax.f32 %v525_v34, %v528_v33  ;;  %549 = vrot.lane.b32.xlu2 %v318_v9, %s972_s23 }
 0x285   : > { %921 = vset.pattern.permute.xlu2 %v975_v5 }
 0x286   : > { %v530_v37 = vsub.f32 %v525_v34, %v529_v35  ;;  %589 = vst.msk [vmem:[#allocation2] sm:$0xff] %vm547_vm3, %v529_v35  ;;  %535 = vperm.xlu0 %919, %v529_v35  }
 0x288   : > { %v531_v3 = vmul.f32 1.442695, %v530_v37 }
 0x28c   : > { %642 = vrot.lane.b32.xlu2 %v318_v9, %s974_s25 }
 0x28d   : > { %v618_v40 = vld [vmem:[#allocation2] sm:$0xff] }
 0x28e   : > { %v622_v41 = vmax.f32 %v618_v40, %v621_v39  ;;  %925 = vset.pattern.permute.xlu0 %v975_v5  ;;  %v437_v5 = vmul.f32 1.442695, %v436_v32 }
 0x290   : > { %v623_v42 = vsub.f32 %v618_v40, %v622_v41  ;;  %682 = vst.msk [vmem:[#allocation2] sm:$0xff] %vm640_vm4, %v622_v41  ;;  %628 = vperm.xlu1 %920, %v622_v41  }
 0x291   : > { %v457_v45 = vpop.permute.xlu1 %456 }
 0x292   : > { %477 = vmatpush.msra.mxu3 %v457_v45  ;;  %v624_v6 = vmul.f32 1.442695, %v623_v42 }
 0x294   : > { %396 = vperm.xlu2 %921, %v932_v43  }
 0x298   : > { %922 = vset.pattern.permute.xlu1 %v977_v26 }
 0x29c   : > { %923 = vset.pattern.permute.xlu2 %v978_v27 }
 0x2ba   : > { %365 = vadd.xlane.f32.xlu1 %v364_v44 }
 0x2d6   : > { %v442_v46 = vpop.permute.xlu2 %441 }
 0x2d7   : > { %v444_v47 = vsub.f32 %v428_v20, %v442_v46 }
 0x2d9   : > { %v445_v48 = vmul.f32 1.442695, %v444_v47 }
 0x2db   : > { %933 = vpow2.f32 %v445_v48 }
 0x2de   : > { %v550_v49 = vpop.permute.xlu2 %549 }
 0x2df   : > { %570 = vmatpush.msrb.mxu3 %v550_v49 }
 0x2e1   : > { %v934_v50 = vpop.eup %933 }
 0x2e2   : > { %872 = vmatmul.msk.f32.vlgmr.msra.gmra.mxu3 %vm319_vm0, %v934_v50  ;;  %v449_v51 = vsel %vm319_vm0, %v934_v50, 0.0 }
 0x2e3   : > { %450 = vadd.xlane.f32.xlu0 %v449_v51 }
 0x2e6   : > { %v643_v52 = vpop.permute.xlu2 %642 }
 0x2e7   : > { %663 = vmatpush.msrb.mxu2 %v643_v52 }
 0x2ee   : > { %v397_v54 = vpop.permute.xlu2 %396 }
 0x2ef   : > { %v399_v55 = vmul.f32 %v397_v54, %v393_v53 }
 0x2f1   : > { %v400_v56 = vadd.f32 %v399_v55, %v1054_v19 }
 0x2f3   : > { %401 = vst.msk [vmem:[#allocation4] sm:$0xff] %vm319_vm0, %v400_v56 }
 0x2f8   : > { %v536_v57 = vpop.permute.xlu0 %535 }
 0x2f9   : > { %v538_v58 = vsub.f32 %v1057_v22, %v536_v57 }
 0x2fa   : > { %v482_v31 = vld [vmem:[#allocation4] sm:$0xff] }
 0x2fb   : > { %v539_v59 = vmul.f32 1.442695, %v538_v58 }
 0x2fd   : > { %935 = vpow2.f32 %v539_v59 }
 0x302   : > { %v629_v60 = vpop.permute.xlu1 %628 }
 0x303   : > { %v936_v61 = vpop.eup %935  ;;  %v631_v62 = vsub.f32 %v1059_v23, %v629_v60 }
 0x304   : > { %875 = vmatmul.msk.f32.vlgmr.msrb.gmra.mxu3 %vm319_vm0, %v936_v61  ;;  %v543_v63 = vsel %vm319_vm0, %v936_v61, 0.0 }
 0x305   : > { %v632_v0 = vmul.f32 1.442695, %v631_v62  ;;  %544 = vadd.xlane.f32.xlu2 %v543_v63 }
 0x307   : > { %937 = vpow2.f32 %v632_v0 }
 0x308   : > { %939 = vpow2.f32 %v531_v3 }
 0x309   : > { %941 = vpow2.f32 %v437_v5 }
 0x30a   : > { %943 = vpow2.f32 %v624_v6 }
 0x30d   : > { %v938_v1 = vpop.eup %937 }
 0x30e   : > { %878 = vmatmul.msk.f32.vlgmr.msrb.gmra.mxu2 %vm319_vm0, %v938_v1  ;;  %v636_v2 = vsel %vm319_vm0, %v938_v1, 0.0  ;;  %v940_v4 = vpop.eup %939 }
 0x30f   : > { %637 = vadd.xlane.f32.xlu1 %v636_v2  ;;  %v942_v7 = vpop.eup %941 }
 0x310   : > { %v944_v11 = vpop.eup %943 }
 0x31d   : > { %578 = vperm.xlu2 %923, %v940_v4  }
 0x328   : > { %485 = vperm.xlu1 %922, %v942_v7  }
 0x32d   : > { %v366_v9 = vpop.xlane.xlu1 %365 }
 0x32e   : > { %v367_v10 = vadd.f32 %v366_v9, %v363_v8 }
 0x330   : > { %369 = vst.msk [vmem:[#allocation3] sm:$0xff] %vm368_vm1, %v367_v10  ;;  %924 = vset.pattern.permute.xlu1 %v979_v28 }
 0x331   : > { %671 = vperm.xlu1 %924, %v944_v11  }
 0x337   : > { %v447_v12 = vld [vmem:[#allocation3] sm:$0xff] }
 0x338   : > { %v448_v13 = vmul.f32 %v942_v7, %v447_v12 }
 0x339   : > { %926 = vset.pattern.permute.xlu1 %v977_v26 }
 0x356   : > { %v451_v14 = vpop.xlane.xlu0 %450 }
 0x357   : > { %v452_v15 = vadd.f32 %v451_v14, %v448_v13 }
 0x359   : > { %454 = vst.msk [vmem:[#allocation3] sm:$0xff] %vm453_vm2, %v452_v15 }
 0x360   : > { %v541_v17 = vld [vmem:[#allocation3] sm:$0xff] }
 0x361   : > { %v542_v18 = vmul.f32 %v940_v4, %v541_v17 }
 0x365   : > { %v479_v16 = vpop.f32.mrf.mxu3 }
 0x366   : > { %490 = vrot.lane.b32.xlu0 %v479_v16, %s980_s29 }
 0x378   : > { %v545_v19 = vpop.xlane.xlu2 %544 }
 0x379   : > { %v546_v20 = vadd.f32 %v545_v19, %v542_v18 }
 0x37b   : > { %548 = vst.msk [vmem:[#allocation3] sm:$0xff] %vm547_vm3, %v546_v20 }
 0x380   : > { %v579_v36 = vpop.permute.xlu2 %578 }
 0x382   : > { %v634_v21 = vld [vmem:[#allocation3] sm:$0xff]  ;;  %v638_v23 = vpop.xlane.xlu1 %637 }
 0x383   : > { %v635_v22 = vmul.f32 %v944_v11, %v634_v21 }
 0x385   : > { %v639_v24 = vadd.f32 %v638_v23, %v635_v22 }
 0x387   : > { %641 = vst.msk [vmem:[#allocation3] sm:$0xff] %vm640_vm4, %v639_v24  ;;  %v572_v25 = vpop.f32.mrf.mxu3 }
 0x388   : > { %583 = vrot.lane.b32.xlu0 %v572_v25, %s981_s30 }
 0x38e   : > { %v696_v26 = vld [vmem:[#allocation3] sm:$0xff] }
 0x38f   : > { %945 = vrcp.f32 %v696_v26 }
 0x391   : > { %v665_v27 = vpop.f32.mrf.mxu2 }
 0x392   : > { %676 = vrot.lane.b32.xlu2 %v665_v27, %s982_s4 }
 0x395   : > { %v946_v29 = vpop.eup %945 }
 0x396   : > { %701 = vperm.xlu1 %926, %v946_v29   ;;  %691 = vperm.xlu0 %925, %v946_v29  }
 0x39a   : > { %711 = vperm.xlu2 %923, %v946_v29   ;;  %v486_v30 = vpop.permute.xlu1 %485 }
 0x39b   : > { %v488_v32 = vmul.f32 %v486_v30, %v482_v31 }
 0x39e   : > { %927 = vset.pattern.permute.xlu1 %v979_v28  ;;  %928 = vset.pattern.permute.xlu0 %v979_v28 }
 0x39f   : > { %721 = vperm.xlu1 %927, %v946_v29  }
 0x3a3   : > { %v672_v40 = vpop.permute.xlu1 %671 }
 0x3d8   : > { %v491_v33 = vpop.permute.xlu0 %490 }
 0x3d9   : > { %v493_v34 = vadd.f32 %v491_v33, %v488_v32 }
 0x3db   : > { %495 = vst.msk [vmem:[#allocation4] sm:$0xff] %vm494_vm6, %v493_v34 }
 0x3e2   : > { %v575_v35 = vld [vmem:[#allocation4] sm:$0xff] }
 0x3e3   : > { %v581_v37 = vmul.f32 %v579_v36, %v575_v35 }
 0x3ec   : > { %v677_v42 = vpop.permute.xlu2 %676 }
 0x3f4   : > { %v712_v50 = vpop.permute.xlu2 %711 }
 0x3fa   : > { %v584_v38 = vpop.permute.xlu0 %583 }
 0x3fb   : > { %v586_v39 = vadd.f32 %v584_v38, %v581_v37 }
 0x3fd   : > { %588 = vst.msk [vmem:[#allocation4] sm:$0xff] %vm587_vm7, %v586_v39 }
 0x404   : > { %v668_v41 = vld [vmem:[#allocation4] sm:$0xff] }
 0x405   : > { %v674_v28 = vmul.f32 %v672_v40, %v668_v41 }
 0x407   : > { %v679_v43 = vadd.f32 %v677_v42, %v674_v28 }
 0x408   : > { %v692_v45 = vpop.permute.xlu0 %691  ;;  %v702_v47 = vpop.permute.xlu1 %701 }
 0x409   : > { %681 = vst.msk [vmem:[#allocation4] sm:$0xff] %vm680_vm8, %v679_v43 }
 0x410   : > { %v688_v44 = vld [vmem:[#allocation4] sm:$0xff] }
 0x411   : > { %v694_v46 = vmul.f32 %v692_v45, %v688_v44  ;;  %v722_v53 = vpop.permute.xlu1 %721 }
 0x413   : > { %695 = vst.msk [vmem:[#allocation4] sm:$0xff] %vm319_vm0, %v694_v46 }
 0x41a   : > { %v698_v48 = vld [vmem:[#allocation4] sm:$0xff] }
 0x41b   : > { %v704_v49 = vmul.f32 %v702_v47, %v698_v48 }
 0x41d   : > { %705 = vst.msk [vmem:[#allocation4] sm:$0xff] %vm494_vm6, %v704_v49 }
 0x424   : > { %v708_v51 = vld [vmem:[#allocation4] sm:$0xff] }
 0x425   : > { %v714_v52 = vmul.f32 %v712_v50, %v708_v51 }
 0x427   : > { %715 = vst.msk [vmem:[#allocation4] sm:$0xff] %vm587_vm7, %v714_v52 }
 0x42e   : > { %v718_v54 = vld [vmem:[#allocation4] sm:$0xff] }
 0x42f   : > { %v724_v55 = vmul.f32 %v722_v53, %v718_v54 }
 0x431   : > { %725 = vst.msk [vmem:[#allocation4] sm:$0xff] %vm680_vm8, %v724_v55 }
 0x438   : > { %v726_v56 = vld [vmem:[#allocation4] sm:$0xff] }
 0x439   : > { %728 = vst.msk [vmem:[%s307_s7] sm:$0xff] %vm314_vm5, %v726_v56 }
 0x43a PF: > { %s13_s14 = sadd.s32 1, %s969_s14   ;;  %s1134_s12 = smov %s965_s13 }
 0x43b   : > { %p10_p5 = scmp.ge.s32.totalorder %s13_s14, 4   ;;  %s1135_s13 = smov %s1137_s15 }
 0x43d   :  { %12 = sbr.rel (!%p10_p5) target bundleno = 2 (0x2), region = 76 }

</bundles_post_ra>
